<compile_context>
chip_gen: v6e
topology: v6e:2x2x1
jax: 0.10.0
libtpu: 0.0.40
codegen_flags: <defaults>
</compile_context>

<pallas_src>
import functools

import jax
import jax.numpy as jnp
from jax.experimental import pallas as pl
from jax.experimental.pallas import tpu as pltpu


HEAD_PAD = 128  # lane-dense padded width for the head output


# ----------------------------------------------------------------------------
# Fused kernel: EmbeddingBag(mean) -> TCN (all levels) -> seq mean -> head
# One grid step processes `tb` batches (tb * window rows).
# ----------------------------------------------------------------------------
def fused_tcn_kernel(texts_ref, emb_ref, wprev_ref, wcur_ref, bconv_ref,
                     wh_ref, bh_ref, o_ref, *, levels, window, bag, tb):
    V, C = emb_ref.shape
    M = tb * window                                                    # rows this block

    # ---- EmbeddingBag(mode='mean') as a counts-matmul (no [N,V] one-hot) ----
    idx = texts_ref[...].reshape(M, bag)                               # [M, bag] int32
    iota_v = jax.lax.broadcasted_iota(jnp.int32, (M, V), 1)
    counts = jnp.zeros((M, V), jnp.float32)
    for j in range(bag):                                               # bag is tiny/static
        counts = counts + (iota_v == idx[:, j:j + 1]).astype(jnp.float32)
    x = jnp.dot(counts, emb_ref[...],
                preferred_element_type=jnp.float32) * (1.0 / bag)      # [M, C]

    # per-row position inside its own sequence (causal mask; also kills roll wrap)
    t = jax.lax.broadcasted_iota(jnp.int32, (M, 1), 0) % window

    # ---- TCN: levels x [2 causal dilated convs + residual], statically unrolled ----
    for lv in range(levels):
        d = 2 ** lv
        h = x
        for conv in range(2):
            wp = wprev_ref[2 * lv + conv]                              # [C, C] tap k-1
            wc = wcur_ref[2 * lv + conv]                               # [C, C] tap k
            b = bconv_ref[2 * lv + conv]                               # [1, C]
            z = jnp.dot(h, wc, preferred_element_type=jnp.float32) + b
            if d < window:
                # prev[row] = h[row - d]; mask zeroes t<d rows (left pad + wrap rows)
                prev = pltpu.roll(h, shift=d, axis=0)
                prev = jnp.where(t < d, 0.0, prev)
                z = z + jnp.dot(prev, wp, preferred_element_type=jnp.float32)
            # else: every prev row is zero-masked anyway -> drop the tap entirely
            h = jnp.maximum(z, 0.0)
        x = jnp.maximum(h + x, 0.0)                                    # residual + ReLU

    # ---- mean over sequence + (Linear with BN folded) + ReLU, lane-dense output ----
    pooled = jnp.mean(x.reshape(tb, window, C), axis=1)                # [tb, C]
    z = jnp.dot(pooled, wh_ref[...],
                preferred_element_type=jnp.float32) + bh_ref[...]      # [tb, HEAD_PAD]
    o_ref[0] = jnp.maximum(z, 0.0)


# ----------------------------------------------------------------------------
# Wrapper: packs weights (per-tap conv matrices, BN folded + lane-padded head)
# ----------------------------------------------------------------------------
def cps_tcn_forward(texts, params, *, window, bag, batch_tile=1):
    B = texts.shape[0]
    V, C = params["embedding"].shape
    levels = len(params["blocks"])
    O = params["head"]["w"].shape[1]
    TB = batch_tile
    assert B % TB == 0, (B, TB)
    nblk = B // TB

    # Stack per-(level, conv) tap matrices separately (no lane concat in-kernel).
    wprev = jnp.stack([blk[f"w{i}_prev"] for blk in params["blocks"] for i in (1, 2)],
                      axis=0)                                          # [2L, C, C]
    wcur = jnp.stack([blk[f"w{i}_cur"] for blk in params["blocks"] for i in (1, 2)],
                     axis=0)                                           # [2L, C, C]
    bconv = jnp.stack([blk[f"b{i}"] for blk in params["blocks"] for i in (1, 2)],
                      axis=0)                                          # [2L, 1, C]

    # Fold eval-mode BatchNorm1d into the linear head; pad the out dim to 128 lanes.
    hp = params["head"]
    scale = hp["gamma"] * jax.lax.rsqrt(hp["var"] + 1e-5)              # [1, O]
    w_eff = hp["w"] * scale                                            # [C, O]
    b_eff = (hp["b"] - hp["mean"]) * scale + hp["beta"]                # [1, O]
    wh = jnp.zeros((C, HEAD_PAD), jnp.float32).at[:, :O].set(w_eff)
    bh = jnp.zeros((1, HEAD_PAD), jnp.float32).at[:, :O].set(b_eff)

    texts3 = texts.reshape(B, window, bag).astype(jnp.int32)

    # Advisory cost estimate (real MXU dots + bytes actually touched).
    M_tot = B * window
    flops = 2 * M_tot * V * C                                          # counts @ emb
    for lv in range(levels):
        taps = 2 if (2 ** lv) < window else 1
        flops += 2 * (2 * taps * M_tot * C * C)                        # 2 convs / level
    flops += 2 * B * C * HEAD_PAD                                      # head
    bytes_accessed = 4 * (texts3.size + params["embedding"].size + wprev.size
                          + wcur.size + bconv.size + wh.size + bh.size
                          + B * HEAD_PAD)

    # VMEM budget: double-buffered resident set + headroom for activations.
    weight_bytes = 4 * (params["embedding"].size + wprev.size + wcur.size
                        + bconv.size + wh.size + bh.size)
    io_block_bytes = 4 * (TB * window * bag + TB * HEAD_PAD)
    vmem_limit = int(2 * (weight_bytes + io_block_bytes) + (8 << 20))

    kernel = functools.partial(fused_tcn_kernel, levels=levels,
                               window=window, bag=bag, tb=TB)
    out = pl.pallas_call(
        kernel,
        out_shape=jax.ShapeDtypeStruct((nblk, TB, HEAD_PAD), jnp.float32),
        grid=(nblk,),
        in_specs=[
            pl.BlockSpec((TB, window, bag), lambda i: (i, 0, 0)),      # token ids
            pl.BlockSpec((V, C), lambda i: (0, 0)),                    # embedding
            pl.BlockSpec(wprev.shape, lambda i: (0, 0, 0)),
            pl.BlockSpec(wcur.shape, lambda i: (0, 0, 0)),
            pl.BlockSpec(bconv.shape, lambda i: (0, 0, 0)),
            pl.BlockSpec((C, HEAD_PAD), lambda i: (0, 0)),
            pl.BlockSpec((1, HEAD_PAD), lambda i: (0, 0)),
        ],
        out_specs=pl.BlockSpec((1, TB, HEAD_PAD), lambda i: (i, 0, 0)),
        compiler_params=pltpu.CompilerParams(
            dimension_semantics=("parallel",),
            vmem_limit_bytes=vmem_limit),
        cost_estimate=pl.CostEstimate(flops=int(flops), transcendentals=0,
                                      bytes_accessed=int(bytes_accessed)),
    )(texts3, params["embedding"], wprev, wcur, bconv, wh, bh)
    return out.reshape(B, HEAD_PAD)[:, :O]


# ----------------------------------------------------------------------------
# Pure-JAX reference (same eval semantics) for correctness checking
# ----------------------------------------------------------------------------
def reference_forward(texts, params, *, window, bag):
    B = texts.shape[0]
    C = params["embedding"].shape[1]
    hi = jax.lax.Precision.HIGHEST
    emb = jnp.take(params["embedding"], texts, axis=0)                 # [B, W*bag, C]
    x = emb.reshape(B, window, bag, C).mean(axis=2)                    # [B, W, C]
    for i, blk in enumerate(params["blocks"]):
        d = 2 ** i
        h = x
        for wp, wc, b in ((blk["w1_prev"], blk["w1_cur"], blk["b1"]),
                          (blk["w2_prev"], blk["w2_cur"], blk["b2"])):
            prev = jnp.pad(h, ((0, 0), (d, 0), (0, 0)))[:, :window, :]
            h = jax.nn.relu(jnp.dot(prev, wp, precision=hi)
                            + jnp.dot(h, wc, precision=hi) + b)
        x = jax.nn.relu(h + x)
    pooled = x.mean(axis=1)
    hp = params["head"]
    z = jnp.dot(pooled, hp["w"], precision=hi) + hp["b"]
    z = (z - hp["mean"]) * jax.lax.rsqrt(hp["var"] + 1e-5) * hp["gamma"] + hp["beta"]
    return jax.nn.relu(z)


# ----------------------------------------------------------------------------
# Deterministic parameter init (shapes follow CpsTcnModel.__init__)
# ----------------------------------------------------------------------------
def init_params(key, vocab_size, embed_dim, output_size, levels):
    keys = jax.random.split(key, 3 + 4 * levels)
    params = {}
    # Embedding.init_weights: uniform(-0.5, 0.5)
    params["embedding"] = jax.random.uniform(
        keys[0], (vocab_size, embed_dim), jnp.float32, -0.5, 0.5)

    blocks = []
    for lv in range(levels):
        k = keys[1 + 4 * lv: 1 + 4 * (lv + 1)]
        scale = 0.1
        blocks.append(dict(
            # Conv1d weight [C_out, C_in, K=2] -> two [C_in, C_out] matrices
            w1_prev=scale * jax.random.normal(k[0], (embed_dim, embed_dim), jnp.float32),
            w1_cur=scale * jax.random.normal(k[1], (embed_dim, embed_dim), jnp.float32),
            b1=jnp.zeros((1, embed_dim), jnp.float32),
            w2_prev=scale * jax.random.normal(k[2], (embed_dim, embed_dim), jnp.float32),
            w2_cur=scale * jax.random.normal(k[3], (embed_dim, embed_dim), jnp.float32),
            b2=jnp.zeros((1, embed_dim), jnp.float32),
        ))
    params["blocks"] = blocks

    # linear: uniform(-0.5, 0.5), bias zero; BatchNorm1d default affine + running stats
    params["head"] = dict(
        w=jax.random.uniform(keys[-2], (embed_dim, output_size), jnp.float32, -0.5, 0.5),
        b=jnp.zeros((1, output_size), jnp.float32),
        gamma=jnp.ones((1, output_size), jnp.float32),
        beta=jnp.zeros((1, output_size), jnp.float32),
        mean=jnp.zeros((1, output_size), jnp.float32),
        var=jnp.ones((1, output_size), jnp.float32),
    )
    return params


if __name__ == "__main__":
    # Small, forward-consistent shapes
    BATCH = 2
    VOCAB = 50
    EMBED_DIM = 32       # parameters.embedding_size
    OUTPUT_SIZE = 11
    LEVELS = 2
    WINDOW = 8           # sequence length after EmbeddingBag
    BAG = 4              # tokens pooled per bag (evenly spaced offsets)

    key = jax.random.PRNGKey(0)
    k_param, k_text = jax.random.split(key)

    params = init_params(k_param, VOCAB, EMBED_DIM, OUTPUT_SIZE, LEVELS)
    texts = jax.random.randint(k_text, (BATCH, WINDOW * BAG), 0, VOCAB, jnp.int32)

    fwd = jax.jit(functools.partial(cps_tcn_forward, window=WINDOW, bag=BAG,
                                    batch_tile=1))
    out = jax.block_until_ready(fwd(texts, params))
    ref = jax.block_until_ready(reference_forward(texts, params, window=WINDOW, bag=BAG))

    assert out.shape == (BATCH, OUTPUT_SIZE), out.shape
    assert bool(jnp.all(jnp.isfinite(out)))
    assert bool(jnp.allclose(out, ref, rtol=1e-3, atol=1e-3)), (out, ref)
    print("KERNEL_OK")
</pallas_src>

<mosaic_0001>
module attributes {stable_mosaic.version = 11 : i64} {
  func.func @fused_tcn_kernel(%arg0: i32, %arg1: memref<1x8x4xi32, #tpu.memory_space<vmem>>, %arg2: memref<50x32xf32, #tpu.memory_space<vmem>>, %arg3: memref<4x32x32xf32, #tpu.memory_space<vmem>>, %arg4: memref<4x32x32xf32, #tpu.memory_space<vmem>>, %arg5: memref<4x1x32xf32, #tpu.memory_space<vmem>>, %arg6: memref<32x128xf32, #tpu.memory_space<vmem>>, %arg7: memref<1x128xf32, #tpu.memory_space<vmem>>, %arg8: memref<1x1x128xf32, #tpu.memory_space<vmem>>) attributes {dimension_semantics = [#tpu.dimension_semantics<parallel>], iteration_bounds = array<i64: 2>, scalar_prefetch = 0 : i64, scratch_operands = 0 : i64, tpu.core_type = #tpu.core_type<tc>, window_params = [{transform_indices = @transform_0, window_bounds = array<i64: 1, 8, 4>}, {pipeline_mode = #tpu.pipeline_mode<synchronous>, transform_indices = @transform_1, window_bounds = array<i64: 50, 32>}, {pipeline_mode = #tpu.pipeline_mode<synchronous>, transform_indices = @transform_2, window_bounds = array<i64: 4, 32, 32>}, {pipeline_mode = #tpu.pipeline_mode<synchronous>, transform_indices = @transform_3, window_bounds = array<i64: 4, 32, 32>}, {pipeline_mode = #tpu.pipeline_mode<synchronous>, transform_indices = @transform_4, window_bounds = array<i64: 4, 1, 32>}, {pipeline_mode = #tpu.pipeline_mode<synchronous>, transform_indices = @transform_5, window_bounds = array<i64: 32, 128>}, {pipeline_mode = #tpu.pipeline_mode<synchronous>, transform_indices = @transform_6, window_bounds = array<i64: 1, 128>}, {transform_indices = @transform_7, window_bounds = array<i64: 1, 1, 128>}]} {
    %c0 = arith.constant 0 : index
    %c0_0 = arith.constant 0 : index
    %c0_1 = arith.constant 0 : index
    %0 = vector.load %arg1[%c0, %c0_0, %c0_1] : memref<1x8x4xi32, #tpu.memory_space<vmem>>, vector<1x8x4xi32>
    %1 = vector.shape_cast %0 : vector<1x8x4xi32> to vector<8x4xi32>
    %2 = tpu.iota {dimensions = array<i32: 1>} : vector<8x50xi32>
    %cst = arith.constant 0.000000e+00 : f32
    %3 = vector.broadcast %cst : f32 to vector<8x50xf32>
    %4 = vector.extract_strided_slice %1 {offsets = [0, 0], sizes = [8, 1], strides = [1, 1]} : vector<8x4xi32> to vector<8x1xi32>
    %5 = vector.broadcast %4 : vector<8x1xi32> to vector<8x50xi32>
    %6 = arith.cmpi eq, %2, %5 : vector<8x50xi32>
    %7 = arith.extui %6 : vector<8x50xi1> to vector<8x50xi32>
    %8 = arith.sitofp %7 : vector<8x50xi32> to vector<8x50xf32>
    %9 = arith.addf %3, %8 : vector<8x50xf32>
    %10 = vector.extract_strided_slice %1 {offsets = [0, 1], sizes = [8, 1], strides = [1, 1]} : vector<8x4xi32> to vector<8x1xi32>
    %11 = vector.broadcast %10 : vector<8x1xi32> to vector<8x50xi32>
    %12 = arith.cmpi eq, %2, %11 : vector<8x50xi32>
    %13 = arith.extui %12 : vector<8x50xi1> to vector<8x50xi32>
    %14 = arith.sitofp %13 : vector<8x50xi32> to vector<8x50xf32>
    %15 = arith.addf %9, %14 : vector<8x50xf32>
    %16 = vector.extract_strided_slice %1 {offsets = [0, 2], sizes = [8, 1], strides = [1, 1]} : vector<8x4xi32> to vector<8x1xi32>
    %17 = vector.broadcast %16 : vector<8x1xi32> to vector<8x50xi32>
    %18 = arith.cmpi eq, %2, %17 : vector<8x50xi32>
    %19 = arith.extui %18 : vector<8x50xi1> to vector<8x50xi32>
    %20 = arith.sitofp %19 : vector<8x50xi32> to vector<8x50xf32>
    %21 = arith.addf %15, %20 : vector<8x50xf32>
    %22 = vector.extract_strided_slice %1 {offsets = [0, 3], sizes = [8, 1], strides = [1, 1]} : vector<8x4xi32> to vector<8x1xi32>
    %23 = vector.broadcast %22 : vector<8x1xi32> to vector<8x50xi32>
    %24 = arith.cmpi eq, %2, %23 : vector<8x50xi32>
    %25 = arith.extui %24 : vector<8x50xi1> to vector<8x50xi32>
    %26 = arith.sitofp %25 : vector<8x50xi32> to vector<8x50xf32>
    %27 = arith.addf %21, %26 : vector<8x50xf32>
    %c0_2 = arith.constant 0 : index
    %c0_3 = arith.constant 0 : index
    %28 = vector.load %arg2[%c0_2, %c0_3] : memref<50x32xf32, #tpu.memory_space<vmem>>, vector<50x32xf32>
    %cst_4 = arith.constant dense<0.000000e+00> : vector<8x32xf32>
    %29 = tpu.matmul %27, %28, %cst_4 {dimension_numbers = #tpu.dot_dimension_numbers<[1], [0], [0], [1], [0, 0, 1, 1], [], []>} : vector<8x50xf32>, vector<50x32xf32>, vector<8x32xf32> -> vector<8x32xf32>
    %cst_5 = arith.constant 2.500000e-01 : f32
    %30 = vector.broadcast %cst_5 : f32 to vector<8x32xf32>
    %31 = arith.mulf %29, %30 : vector<8x32xf32>
    %32 = tpu.iota {dimensions = array<i32: 0>} : vector<8x1xi32>
    %c8_i32 = arith.constant 8 : i32
    %c0_i32 = arith.constant 0 : i32
    %33 = arith.cmpi eq, %c8_i32, %c0_i32 : i32
    %c1_i32 = arith.constant 1 : i32
    %34 = arith.select %33, %c1_i32, %c8_i32 : i32
    %35 = vector.broadcast %34 : i32 to vector<8x1xi32>
    %36 = arith.remsi %32, %35 : vector<8x1xi32>
    %c0_i32_6 = arith.constant 0 : i32
    %37 = vector.broadcast %c0_i32_6 : i32 to vector<8x1xi32>
    %38 = arith.cmpi ne, %36, %37 : vector<8x1xi32>
    %c0_i32_7 = arith.constant 0 : i32
    %39 = vector.broadcast %c0_i32_7 : i32 to vector<8x1xi32>
    %40 = arith.cmpi slt, %36, %39 : vector<8x1xi32>
    %c0_i32_8 = arith.constant 0 : i32
    %41 = arith.cmpi slt, %34, %c0_i32_8 : i32
    %42 = vector.broadcast %41 : i1 to vector<8x1xi1>
    %43 = vector.broadcast %42 : vector<8x1xi1> to vector<8x1xi1>
    %44 = arith.xori %40, %43 : vector<8x1xi1>
    %45 = arith.andi %44, %38 : vector<8x1xi1>
    %46 = vector.broadcast %34 : i32 to vector<8x1xi32>
    %47 = arith.addi %36, %46 : vector<8x1xi32>
    %48 = arith.select %45, %47, %36 : vector<8x1xi1>, vector<8x1xi32>
    %c0_9 = arith.constant 0 : index
    %c0_10 = arith.constant 0 : index
    %c0_11 = arith.constant 0 : index
    %49 = vector.load %arg3[%c0_9, %c0_10, %c0_11] : memref<4x32x32xf32, #tpu.memory_space<vmem>>, vector<1x32x32xf32>
    %50 = vector.shape_cast %49 : vector<1x32x32xf32> to vector<32x32xf32>
    %c0_12 = arith.constant 0 : index
    %c0_13 = arith.constant 0 : index
    %c0_14 = arith.constant 0 : index
    %51 = vector.load %arg4[%c0_12, %c0_13, %c0_14] : memref<4x32x32xf32, #tpu.memory_space<vmem>>, vector<1x32x32xf32>
    %52 = vector.shape_cast %51 : vector<1x32x32xf32> to vector<32x32xf32>
    %c0_15 = arith.constant 0 : index
    %c0_16 = arith.constant 0 : index
    %c0_17 = arith.constant 0 : index
    %53 = vector.load %arg5[%c0_15, %c0_16, %c0_17] : memref<4x1x32xf32, #tpu.memory_space<vmem>>, vector<1x1x32xf32>
    %54 = vector.shape_cast %53 : vector<1x1x32xf32> to vector<1x32xf32>
    %cst_18 = arith.constant dense<0.000000e+00> : vector<8x32xf32>
    %55 = tpu.matmul %31, %52, %cst_18 {dimension_numbers = #tpu.dot_dimension_numbers<[1], [0], [0], [1], [0, 0, 1, 1], [], []>} : vector<8x32xf32>, vector<32x32xf32>, vector<8x32xf32> -> vector<8x32xf32>
    %56 = vector.broadcast %54 : vector<1x32xf32> to vector<8x32xf32>
    %57 = arith.addf %55, %56 : vector<8x32xf32>
    %c1_i32_19 = arith.constant 1 : i32
    %58 = tpu.dynamic_rotate %31 by %c1_i32_19 dim 0 : vector<8x32xf32>, i32 -> vector<8x32xf32>
    %c1_i32_20 = arith.constant 1 : i32
    %59 = vector.broadcast %c1_i32_20 : i32 to vector<8x1xi32>
    %60 = arith.cmpi slt, %48, %59 : vector<8x1xi32>
    %cst_21 = arith.constant 0.000000e+00 : f32
    %61 = vector.shape_cast %60 : vector<8x1xi1> to vector<8x1xi1>
    %62 = vector.broadcast %61 : vector<8x1xi1> to vector<8x32xi1>
    %63 = vector.broadcast %cst_21 : f32 to vector<8x32xf32>
    %64 = arith.select %62, %63, %58 : vector<8x32xi1>, vector<8x32xf32>
    %cst_22 = arith.constant dense<0.000000e+00> : vector<8x32xf32>
    %65 = tpu.matmul %64, %50, %cst_22 {dimension_numbers = #tpu.dot_dimension_numbers<[1], [0], [0], [1], [0, 0, 1, 1], [], []>} : vector<8x32xf32>, vector<32x32xf32>, vector<8x32xf32> -> vector<8x32xf32>
    %66 = arith.addf %57, %65 : vector<8x32xf32>
    %cst_23 = arith.constant 0.000000e+00 : f32
    %67 = vector.broadcast %cst_23 : f32 to vector<8x32xf32>
    %68 = arith.maximumf %66, %67 : vector<8x32xf32>
    %c1 = arith.constant 1 : index
    %c0_24 = arith.constant 0 : index
    %c0_25 = arith.constant 0 : index
    %69 = vector.load %arg3[%c1, %c0_24, %c0_25] : memref<4x32x32xf32, #tpu.memory_space<vmem>>, vector<1x32x32xf32>
    %70 = vector.shape_cast %69 : vector<1x32x32xf32> to vector<32x32xf32>
    %c1_26 = arith.constant 1 : index
    %c0_27 = arith.constant 0 : index
    %c0_28 = arith.constant 0 : index
    %71 = vector.load %arg4[%c1_26, %c0_27, %c0_28] : memref<4x32x32xf32, #tpu.memory_space<vmem>>, vector<1x32x32xf32>
    %72 = vector.shape_cast %71 : vector<1x32x32xf32> to vector<32x32xf32>
    %c1_29 = arith.constant 1 : index
    %c0_30 = arith.constant 0 : index
    %c0_31 = arith.constant 0 : index
    %73 = vector.load %arg5[%c1_29, %c0_30, %c0_31] : memref<4x1x32xf32, #tpu.memory_space<vmem>>, vector<1x1x32xf32>
    %74 = vector.shape_cast %73 : vector<1x1x32xf32> to vector<1x32xf32>
    %cst_32 = arith.constant dense<0.000000e+00> : vector<8x32xf32>
    %75 = tpu.matmul %68, %72, %cst_32 {dimension_numbers = #tpu.dot_dimension_numbers<[1], [0], [0], [1], [0, 0, 1, 1], [], []>} : vector<8x32xf32>, vector<32x32xf32>, vector<8x32xf32> -> vector<8x32xf32>
    %76 = vector.broadcast %74 : vector<1x32xf32> to vector<8x32xf32>
    %77 = arith.addf %75, %76 : vector<8x32xf32>
    %c1_i32_33 = arith.constant 1 : i32
    %78 = tpu.dynamic_rotate %68 by %c1_i32_33 dim 0 : vector<8x32xf32>, i32 -> vector<8x32xf32>
    %c1_i32_34 = arith.constant 1 : i32
    %79 = vector.broadcast %c1_i32_34 : i32 to vector<8x1xi32>
    %80 = arith.cmpi slt, %48, %79 : vector<8x1xi32>
    %cst_35 = arith.constant 0.000000e+00 : f32
    %81 = vector.shape_cast %80 : vector<8x1xi1> to vector<8x1xi1>
    %82 = vector.broadcast %81 : vector<8x1xi1> to vector<8x32xi1>
    %83 = vector.broadcast %cst_35 : f32 to vector<8x32xf32>
    %84 = arith.select %82, %83, %78 : vector<8x32xi1>, vector<8x32xf32>
    %cst_36 = arith.constant dense<0.000000e+00> : vector<8x32xf32>
    %85 = tpu.matmul %84, %70, %cst_36 {dimension_numbers = #tpu.dot_dimension_numbers<[1], [0], [0], [1], [0, 0, 1, 1], [], []>} : vector<8x32xf32>, vector<32x32xf32>, vector<8x32xf32> -> vector<8x32xf32>
    %86 = arith.addf %77, %85 : vector<8x32xf32>
    %cst_37 = arith.constant 0.000000e+00 : f32
    %87 = vector.broadcast %cst_37 : f32 to vector<8x32xf32>
    %88 = arith.maximumf %86, %87 : vector<8x32xf32>
    %89 = arith.addf %88, %31 : vector<8x32xf32>
    %cst_38 = arith.constant 0.000000e+00 : f32
    %90 = vector.broadcast %cst_38 : f32 to vector<8x32xf32>
    %91 = arith.maximumf %89, %90 : vector<8x32xf32>
    %c2 = arith.constant 2 : index
    %c0_39 = arith.constant 0 : index
    %c0_40 = arith.constant 0 : index
    %92 = vector.load %arg3[%c2, %c0_39, %c0_40] : memref<4x32x32xf32, #tpu.memory_space<vmem>>, vector<1x32x32xf32>
    %93 = vector.shape_cast %92 : vector<1x32x32xf32> to vector<32x32xf32>
    %c2_41 = arith.constant 2 : index
    %c0_42 = arith.constant 0 : index
    %c0_43 = arith.constant 0 : index
    %94 = vector.load %arg4[%c2_41, %c0_42, %c0_43] : memref<4x32x32xf32, #tpu.memory_space<vmem>>, vector<1x32x32xf32>
    %95 = vector.shape_cast %94 : vector<1x32x32xf32> to vector<32x32xf32>
    %c2_44 = arith.constant 2 : index
    %c0_45 = arith.constant 0 : index
    %c0_46 = arith.constant 0 : index
    %96 = vector.load %arg5[%c2_44, %c0_45, %c0_46] : memref<4x1x32xf32, #tpu.memory_space<vmem>>, vector<1x1x32xf32>
    %97 = vector.shape_cast %96 : vector<1x1x32xf32> to vector<1x32xf32>
    %cst_47 = arith.constant dense<0.000000e+00> : vector<8x32xf32>
    %98 = tpu.matmul %91, %95, %cst_47 {dimension_numbers = #tpu.dot_dimension_numbers<[1], [0], [0], [1], [0, 0, 1, 1], [], []>} : vector<8x32xf32>, vector<32x32xf32>, vector<8x32xf32> -> vector<8x32xf32>
    %99 = vector.broadcast %97 : vector<1x32xf32> to vector<8x32xf32>
    %100 = arith.addf %98, %99 : vector<8x32xf32>
    %c2_i32 = arith.constant 2 : i32
    %101 = tpu.dynamic_rotate %91 by %c2_i32 dim 0 : vector<8x32xf32>, i32 -> vector<8x32xf32>
    %c2_i32_48 = arith.constant 2 : i32
    %102 = vector.broadcast %c2_i32_48 : i32 to vector<8x1xi32>
    %103 = arith.cmpi slt, %48, %102 : vector<8x1xi32>
    %cst_49 = arith.constant 0.000000e+00 : f32
    %104 = vector.shape_cast %103 : vector<8x1xi1> to vector<8x1xi1>
    %105 = vector.broadcast %104 : vector<8x1xi1> to vector<8x32xi1>
    %106 = vector.broadcast %cst_49 : f32 to vector<8x32xf32>
    %107 = arith.select %105, %106, %101 : vector<8x32xi1>, vector<8x32xf32>
    %cst_50 = arith.constant dense<0.000000e+00> : vector<8x32xf32>
    %108 = tpu.matmul %107, %93, %cst_50 {dimension_numbers = #tpu.dot_dimension_numbers<[1], [0], [0], [1], [0, 0, 1, 1], [], []>} : vector<8x32xf32>, vector<32x32xf32>, vector<8x32xf32> -> vector<8x32xf32>
    %109 = arith.addf %100, %108 : vector<8x32xf32>
    %cst_51 = arith.constant 0.000000e+00 : f32
    %110 = vector.broadcast %cst_51 : f32 to vector<8x32xf32>
    %111 = arith.maximumf %109, %110 : vector<8x32xf32>
    %c3 = arith.constant 3 : index
    %c0_52 = arith.constant 0 : index
    %c0_53 = arith.constant 0 : index
    %112 = vector.load %arg3[%c3, %c0_52, %c0_53] : memref<4x32x32xf32, #tpu.memory_space<vmem>>, vector<1x32x32xf32>
    %113 = vector.shape_cast %112 : vector<1x32x32xf32> to vector<32x32xf32>
    %c3_54 = arith.constant 3 : index
    %c0_55 = arith.constant 0 : index
    %c0_56 = arith.constant 0 : index
    %114 = vector.load %arg4[%c3_54, %c0_55, %c0_56] : memref<4x32x32xf32, #tpu.memory_space<vmem>>, vector<1x32x32xf32>
    %115 = vector.shape_cast %114 : vector<1x32x32xf32> to vector<32x32xf32>
    %c3_57 = arith.constant 3 : index
    %c0_58 = arith.constant 0 : index
    %c0_59 = arith.constant 0 : index
    %116 = vector.load %arg5[%c3_57, %c0_58, %c0_59] : memref<4x1x32xf32, #tpu.memory_space<vmem>>, vector<1x1x32xf32>
    %117 = vector.shape_cast %116 : vector<1x1x32xf32> to vector<1x32xf32>
    %cst_60 = arith.constant dense<0.000000e+00> : vector<8x32xf32>
    %118 = tpu.matmul %111, %115, %cst_60 {dimension_numbers = #tpu.dot_dimension_numbers<[1], [0], [0], [1], [0, 0, 1, 1], [], []>} : vector<8x32xf32>, vector<32x32xf32>, vector<8x32xf32> -> vector<8x32xf32>
    %119 = vector.broadcast %117 : vector<1x32xf32> to vector<8x32xf32>
    %120 = arith.addf %118, %119 : vector<8x32xf32>
    %c2_i32_61 = arith.constant 2 : i32
    %121 = tpu.dynamic_rotate %111 by %c2_i32_61 dim 0 : vector<8x32xf32>, i32 -> vector<8x32xf32>
    %c2_i32_62 = arith.constant 2 : i32
    %122 = vector.broadcast %c2_i32_62 : i32 to vector<8x1xi32>
    %123 = arith.cmpi slt, %48, %122 : vector<8x1xi32>
    %cst_63 = arith.constant 0.000000e+00 : f32
    %124 = vector.shape_cast %123 : vector<8x1xi1> to vector<8x1xi1>
    %125 = vector.broadcast %124 : vector<8x1xi1> to vector<8x32xi1>
    %126 = vector.broadcast %cst_63 : f32 to vector<8x32xf32>
    %127 = arith.select %125, %126, %121 : vector<8x32xi1>, vector<8x32xf32>
    %cst_64 = arith.constant dense<0.000000e+00> : vector<8x32xf32>
    %128 = tpu.matmul %127, %113, %cst_64 {dimension_numbers = #tpu.dot_dimension_numbers<[1], [0], [0], [1], [0, 0, 1, 1], [], []>} : vector<8x32xf32>, vector<32x32xf32>, vector<8x32xf32> -> vector<8x32xf32>
    %129 = arith.addf %120, %128 : vector<8x32xf32>
    %cst_65 = arith.constant 0.000000e+00 : f32
    %130 = vector.broadcast %cst_65 : f32 to vector<8x32xf32>
    %131 = arith.maximumf %129, %130 : vector<8x32xf32>
    %132 = arith.addf %131, %91 : vector<8x32xf32>
    %cst_66 = arith.constant 0.000000e+00 : f32
    %133 = vector.broadcast %cst_66 : f32 to vector<8x32xf32>
    %134 = arith.maximumf %132, %133 : vector<8x32xf32>
    %135 = vector.shape_cast %134 : vector<8x32xf32> to vector<1x8x32xf32>
    %cst_67 = arith.constant dense<0.000000e+00> : vector<1x32xf32>
    %136 = vector.multi_reduction <add>, %135, %cst_67 [1] : vector<1x8x32xf32> to vector<1x32xf32>
    %cst_68 = arith.constant 8.000000e+00 : f32
    %137 = vector.broadcast %cst_68 : f32 to vector<1x32xf32>
    %138 = arith.divf %136, %137 : vector<1x32xf32>
    %c0_69 = arith.constant 0 : index
    %c0_70 = arith.constant 0 : index
    %139 = vector.load %arg6[%c0_69, %c0_70] : memref<32x128xf32, #tpu.memory_space<vmem>>, vector<32x128xf32>
    %cst_71 = arith.constant dense<0.000000e+00> : vector<1x128xf32>
    %140 = tpu.matmul %138, %139, %cst_71 {dimension_numbers = #tpu.dot_dimension_numbers<[1], [0], [0], [1], [0, 0, 1, 1], [], []>} : vector<1x32xf32>, vector<32x128xf32>, vector<1x128xf32> -> vector<1x128xf32>
    %c0_72 = arith.constant 0 : index
    %c0_73 = arith.constant 0 : index
    %141 = vector.load %arg7[%c0_72, %c0_73] : memref<1x128xf32, #tpu.memory_space<vmem>>, vector<1x128xf32>
    %142 = arith.addf %140, %141 : vector<1x128xf32>
    %cst_74 = arith.constant 0.000000e+00 : f32
    %143 = vector.broadcast %cst_74 : f32 to vector<1x128xf32>
    %144 = arith.maximumf %142, %143 : vector<1x128xf32>
    %c0_75 = arith.constant 0 : index
    %c0_76 = arith.constant 0 : index
    %c0_77 = arith.constant 0 : index
    %145 = vector.load %arg8[%c0_75, %c0_76, %c0_77] : memref<1x1x128xf32, #tpu.memory_space<vmem>>, vector<1x1x128xf32>
    %146 = vector.shape_cast %145 : vector<1x1x128xf32> to vector<1x128xf32>
    %147 = vector.shape_cast %144 : vector<1x128xf32> to vector<1x1x128xf32>
    tpu.vector_store %arg8[%c0_75, %c0_76, %c0_77], %147 {strides = array<i32>} : memref<1x1x128xf32, #tpu.memory_space<vmem>>, vector<1x1x128xf32>,
    return
  }
  func.func @transform_0(%arg0: i32) -> (i32, i32, i32) {
    %c0_i32 = arith.constant 0 : i32
    %c0_i32_0 = arith.constant 0 : i32
    %c0_i32_1 = arith.constant 0 : i32
    return %arg0, %c0_i32, %c0_i32_0 : i32, i32, i32
  }
  func.func @transform_1(%arg0: i32) -> (i32, i32) {
    %c0_i32 = arith.constant 0 : i32
    %c0_i32_0 = arith.constant 0 : i32
    %c0_i32_1 = arith.constant 0 : i32
    return %c0_i32, %c0_i32_0 : i32, i32
  }
  func.func @transform_2(%arg0: i32) -> (i32, i32, i32) {
    %c0_i32 = arith.constant 0 : i32
    %c0_i32_0 = arith.constant 0 : i32
    %c0_i32_1 = arith.constant 0 : i32
    %c0_i32_2 = arith.constant 0 : i32
    return %c0_i32, %c0_i32_0, %c0_i32_1 : i32, i32, i32
  }
  func.func @transform_3(%arg0: i32) -> (i32, i32, i32) {
    %c0_i32 = arith.constant 0 : i32
    %c0_i32_0 = arith.constant 0 : i32
    %c0_i32_1 = arith.constant 0 : i32
    %c0_i32_2 = arith.constant 0 : i32
    return %c0_i32, %c0_i32_0, %c0_i32_1 : i32, i32, i32
  }
  func.func @transform_4(%arg0: i32) -> (i32, i32, i32) {
    %c0_i32 = arith.constant 0 : i32
    %c0_i32_0 = arith.constant 0 : i32
    %c0_i32_1 = arith.constant 0 : i32
    %c0_i32_2 = arith.constant 0 : i32
    return %c0_i32, %c0_i32_0, %c0_i32_1 : i32, i32, i32
  }
  func.func @transform_5(%arg0: i32) -> (i32, i32) {
    %c0_i32 = arith.constant 0 : i32
    %c0_i32_0 = arith.constant 0 : i32
    %c0_i32_1 = arith.constant 0 : i32
    return %c0_i32, %c0_i32_0 : i32, i32
  }
  func.func @transform_6(%arg0: i32) -> (i32, i32) {
    %c0_i32 = arith.constant 0 : i32
    %c0_i32_0 = arith.constant 0 : i32
    %c0_i32_1 = arith.constant 0 : i32
    return %c0_i32, %c0_i32_0 : i32, i32
  }
  func.func @transform_7(%arg0: i32) -> (i32, i32, i32) {
    %c0_i32 = arith.constant 0 : i32
    %c0_i32_0 = arith.constant 0 : i32
    %c0_i32_1 = arith.constant 0 : i32
    return %arg0, %c0_i32, %c0_i32_0 : i32, i32, i32
  }
}

</mosaic_0001>

<bundles_post_ra>
// kernel: cps_tcn_forward.1
= control target key start
LH: loop header
LB: loop body
LE: loop exit
PB: predicated region body
PF: predicated region fallthrough
CT: control target
= control target key end

     0   :  { %12 = vsyncpa [#allocation3], 0  ;;  %s1964_s0 = inlined_call_operand.vmem [shape: s32[2,8,4], index: 0, kind: input, shape index: {}]   ;;  %s1965_s1 = inlined_call_operand.vmem [shape: f32[50,32], index: 1, kind: input, shape index: {}]   ;;  %s1966_s2 = inlined_call_operand.vmem [shape: f32[4,32,32], index: 2, kind: input, shape index: {}]   ;;  %s1967_s3 = inlined_call_operand.vmem [shape: f32[4,32,32], index: 3, kind: input, shape index: {}]   ;;  %s1968_s4 = inlined_call_operand.vmem [shape: f32[4,1,32], index: 4, kind: input, shape index: {}]   ;;  %s1969_s5 = inlined_call_operand.vmem [shape: f32[32,128], index: 5, kind: input, shape index: {}]   ;;  %s1970_s6 = inlined_call_operand.vmem [shape: f32[1,128], index: 6, kind: input, shape index: {}]   ;;  %s1971_s7 = inlined_call_operand.hbm [shape: f32[2,1,128], index: 7, kind: output, shape index: {}]  }
   0x1   :  { %14 = vsyncpa [#allocation3 + $0x1], 0  ;;  %s1623_s24 = smov 0   ;;  %s1625_s25 = smov 0  }
   0x2   :  { %s1627_s26 = smov 0   ;;  %s1629_s27 = smov 0  }
   0x3 LB: > { %s1644_s28 = sadd.s32 4294967295, %s1574_s27   ;;  %s1241_s29 = sadd.s32 4294967294, %s1574_s27   ;;  %s1574_s27 = sphi %s1629_s27, %s1981_s27   ;;  %s1570_s26 = sphi %s1627_s26, %s1980_s26   ;;  %s1566_s25 = sphi %s1625_s25, %s1979_s25   ;;  %s1562_s24 = sphi %s1623_s24, %s1978_s24  }
   0x4   : > { %s1648_s30 = sadd.s32 1, %s1574_s27   ;;  %s179_s8 = sadd.s32 1, %s1570_s26 }
   0x5   : > { %s176_s9 = ssub.s32 %s1574_s27, %s1648_s30  ;;  %p189_p0 = scmp.ne.s32.totalorder %s1570_s26, %s1566_s25 }
   0x6   : > { %p177_p1 = scmp.eq.s32.totalorder %s176_s9, 0  ;;  %p190_p2 = scmp.eq.s32.totalorder %s1644_s28, 1 }
   0x7   : > { %p195_p3 = scmp.ne.s32.totalorder %s1566_s25, %s1562_s24  ;;  %p196_p4 = scmp.eq.s32.totalorder %s1241_s29, 1 }
   0x8   : > { %s1659_s10 = scalar_select %p177_p1, %s1570_s26, %s179_s8  }
   0x9   : > { %p1661_p5 = por %p190_p2, %p189_p0  ;;  %p1665_p6 = por %p196_p4, %p195_p3 }
   0xa   : > { %p1244_p7 = scmp.ge.s32.totalorder %s1574_s27, 1  ;;  %p239_p8 = scmp.lt.s32.totalorder %s1574_s27, 3 }
   0xc   : > { %p240_p9 = pnand %p1244_p7, %p239_p8 }
   0xd   : > { %p269_p10 = scmp.lt.s32.totalorder (!%p240_p9), %s1644_s28, 1  ;;  %s267_s14 = sand.u32 (!%p240_p9), 1, %s1566_s25  }
   0xe   : > { %243 = sbr.rel (%p240_p9) target bundleno = 1394 (0x572), region = 48  ;;  %s1292_s17 = sshll.u32 (!%p240_p9), %s1644_s28, 4 }
   0xf   : > { %s268_s18 = scalar_lea.vmem (!%p240_p9), [#allocation2], %s267_s14  ;;  %s1184_s22 = scalar_lea.hbm (!%p240_p9), %s1971_s7, %s1292_s17 }
  0x10   : > { %s1186_s19 = sshll.u32 (!%p240_p9), %s268_s18, 4  ;;  %s1174_s23 = scalar_lea.sflag (!%p240_p9), [#allocation3], %s267_s14  ;;  %s1187_s19 = int_to_ptr.vmem [resolvable:$true] %s1186_s19 }
  0x11   : > { %s1514_s29 = scalar_lea.vmem (!%p240_p9), %s1187_s19, 16  ;;  %s1582_s8 = smov (!%p240_p9), [#allocation2]  }
  0x12   : > { %p1515_p11 = scmp.ne.s32.totalorder (!%p240_p9), %s1187_s19, %s1514_s29  ;;  %s1518_s9 = sshll.u32 (!%p240_p9), %s1582_s8, 4  ;;  %s1519_s9 = int_to_ptr.vmem [resolvable:$false] %s1518_s9 }
  0x13   : > { %v1576_v0 = vmov 0   ;;  %v1577_v1 = vmov 2   ;;  %s270_s13 = scalar_select %p269_p10, %s1644_s28, 1  ;;  %v1578_v2 = vmov 0.0   ;;  %v310_v3 = vld [vmem:[%s1965_s1 + $0x30] sm:$0x3]  ;;  %v274_v16 = vlaneseq }
  0x14   : > { %1509 = vset.pattern.permute.xlu0 %v1576_v0  ;;  %1511 = vset.pattern.permute.xlu1 %v1577_v1  ;;  %vm315_vm0 = vcmask 1041408   ;;  %v309_v4 = vld [vmem:[%s1965_s1 + $0x28] sm:$0xff]  ;;  %v308_v5 = vld [vmem:[%s1965_s1 + $0x20] sm:$0xff]  ;;  %v307_v7 = vld [vmem:[%s1965_s1 + $0x18] sm:$0xff]  ;;  %v1579_v8 = vmov 1   ;;  %v1580_v9 = vmov 3   ;;  %p1516_p12 = pnand %p1515_p11, %p1661_p5  ;;  %p1521_p0 = scmp.lt.s32.totalorder %s1187_s19, %s1519_s9 }
  0x15   : > { %1348 = vmatprep.subr.mxu0 %v1578_v2  ;;  %1365 = vmatprep.subr.mxu1 %v1578_v2  ;;  %s1245_s16 = sshll.u32 %s270_s13, 3  ;;  %v306_v10 = vld [vmem:[%s1965_s1 + $0x10] sm:$0xff]  ;;  %v305_v11 = vld [vmem:[%s1965_s1 + $0x8] sm:$0xff]  ;;  %v304_v12 = vld [vmem:[%s1965_s1] sm:$0xff]  ;;  %vm1581_vm1 = vmmov 0   ;;  %v275_v17 = vand.u32 127, %v274_v16 }
  0x16   : > { %1349 = vmatpush3.msk.msra.mxu0 %vm315_vm0, %v310_v3  ;;  %s272_s21 = scalar_lea.vmem %s1964_s0, %s1245_s16  ;;  %1362 = vmatprep.mubr.msk.f32.mxu0 %vm1581_vm1, %v1578_v2  ;;  %v411_v13 = vld [vmem:[%s1967_s3 + $0x18] sm:$0xff]  ;;  %v410_v14 = vld [vmem:[%s1967_s3 + $0x10] sm:$0xff]  ;;  %v409_v15 = vld [vmem:[%s1967_s3 + $0x8] sm:$0xff]  ;;  %vm311_vm6 = vcmask 408576   ;;  %v1732_v30 = vshrl.u32 %v274_v16, 7  ;;  %vm419_vm7 = vcmask 261120   ;;  %p1517_p13 = pneg %p1516_p12 }
  0x17   : > { %1350 = vmatprep.subr.mxu0 %v1578_v2  ;;  %v273_v6 = vld [vmem:[%s272_s21] sm:$0xff]  ;;  %1373 = vmatprep.mubr.msk.f32.mxu1 %vm1581_vm1, %v1578_v2  ;;  %v407_v33 = vld [vmem:[%s1966_s2 + $0x18] sm:$0xff]  ;;  %v406_v35 = vld [vmem:[%s1966_s2 + $0x10] sm:$0xff]  ;;  %s1520_s28 = scalar_lea.vmem %s1519_s9, 32 }
  0x18   : > { %1351 = vmatpush3.msra.mxu0 %v309_v4  ;;  %277 = vperm.xlu0 %1509, %v273_v6   ;;  %v408_v29 = vld [vmem:[%s1967_s3] sm:$0xff]  ;;  %v396_v36 = vand.u32 7, %v1732_v30  ;;  %v405_v37 = vld [vmem:[%s1966_s2 + $0x8] sm:$0xff]  ;;  %v1262_v42 = vld [vmem:[%s1967_s3 + $0x38] sm:$0xff]  ;;  %p1522_p1 = scmp.lt.s32.totalorder %s1520_s28, %s1514_s29 }
  0x19   : > { %1352 = vmatprep.subr.mxu0 %v1578_v2  ;;  %291 = vperm.xlu1 %1511, %v273_v6   ;;  %v404_v39 = vld [vmem:[%s1966_s2] sm:$0xff]  ;;  %v1261_v43 = vld [vmem:[%s1967_s3 + $0x30] sm:$0xff]  ;;  %v1258_v44 = vld [vmem:[%s1966_s2 + $0x38] sm:$0xff] }
  0x1a   : > { %1353 = vmatpush3.msra.mxu0 %v308_v5  ;;  %1366 = vmatpush3.msra.mxu1 %v411_v13  ;;  %vm1758_vm8 = vcmp.lt.s32.totalorder %v396_v36, 1  ;;  %v1260_v45 = vld [vmem:[%s1967_s3 + $0x28] sm:$0xff]  ;;  %v1257_v46 = vld [vmem:[%s1966_s2 + $0x30] sm:$0xff]  ;;  %v1259_v47 = vld [vmem:[%s1967_s3 + $0x20] sm:$0xff]  ;;  %vm1852_vm9 = vcmp.lt.s32.totalorder %v396_v36, 2  ;;  %p1523_p2 = por %p1522_p1, %p1521_p0 }
  0x1b   : > { %1354 = vmatprep.subr.mxu0 %v1578_v2  ;;  %1367 = vmatprep.subr.mxu1 %v1578_v2  ;;  %v1256_v48 = vld [vmem:[%s1966_s2 + $0x28] sm:$0xff]  ;;  %v1255_v49 = vld [vmem:[%s1966_s2 + $0x20] sm:$0xff]  ;;  %v1274_v60 = vld [vmem:[%s1967_s3 + $0x58] sm:$0xff] }
  0x1c   : > { %1355 = vmatpush3.msra.mxu0 %v307_v7  ;;  %1510 = vset.pattern.permute.xlu0 %v1579_v8  ;;  %v1252_v52 = vld [vmem:[%s1968_s4] ss:$0 sm:$0xff]  ;;  %v1273_v61 = vld [vmem:[%s1967_s3 + $0x50] sm:$0xff]  ;;  %v1270_v62 = vld [vmem:[%s1966_s2 + $0x58] sm:$0xff]  ;;  %p1524_p3 = pnand %p1523_p2, %p1517_p13 }
  0x1d   : > { %1512 = vset.pattern.permute.xlu1 %v1580_v9  ;;  %284 = vperm.xlu0 %1510, %v273_v6   ;;  %v1272_v63 = vld [vmem:[%s1967_s3 + $0x48] sm:$0xff]  ;;  %v1269_v0 = vld [vmem:[%s1966_s2 + $0x50] sm:$0xff]  ;;  %v1271_v1 = vld [vmem:[%s1967_s3 + $0x40] sm:$0xff] }
  0x1e   : > { %298 = vperm.xlu1 %1512, %v273_v6   ;;  %1356 = vmatprep.subr.mxu0 %v1578_v2  ;;  %v1268_v3 = vld [vmem:[%s1966_s2 + $0x48] sm:$0xff]  ;;  %v1267_v4 = vld [vmem:[%s1966_s2 + $0x40] sm:$0xff]  ;;  %v1096_v36 = vld [vmem:[%s1969_s5 + $0x18] sm:$0xff] }
  0x1f   : > { %1357 = vmatpush3.msra.mxu0 %v306_v10  ;;  %1368 = vmatpush3.msra.mxu1 %v410_v14  ;;  %v1264_v5 = vld [vmem:[%s1968_s4 + $0x1] ss:$0 sm:$0xff]  ;;  %v1288_v40 = vld [vmem:[%s1968_s4 + $0x3] ss:$0 sm:$0xff] }
  0x20   : > { %1358 = vmatprep.subr.mxu0 %v1578_v2  ;;  %1369 = vmatprep.subr.mxu1 %v1578_v2 }
  0x21   : > { %1359 = vmatpush3.msra.mxu0 %v305_v11  ;;  %1513 = vset.pattern.permute.xlu0 %v1580_v9 }
  0x22   : > { %1360 = vmatprep.subr.mxu0 %v1578_v2  ;;  %1370 = vmatpush3.msra.mxu1 %v409_v15 }
  0x23   : > { %1361 = vmatpush3.msra.mxu0 %v304_v12  ;;  %1371 = vmatprep.subr.mxu1 %v1578_v2 }
  0x24   : > { %1387 = vmatprep.subr.mxu0 %v1578_v2  ;;  %1372 = vmatpush3.msra.mxu1 %v408_v29 }
  0x25   : > { %1376 = vmatprep.subr.mxu1 %v1578_v2 }
  0x93   : > { %v278_v18 = vpop.permute.xlu0 %277 }
  0x94   : > { %v292_v19 = vpop.permute.xlu1 %291  ;;  %vm279_vm2 = vcmp.eq.s32.totalorder %v275_v17, %v278_v18  ;;  %v1286_v18 = vld [vmem:[%s1967_s3 + $0x78] sm:$0xff] }
  0x95   : > { %vm293_vm3 = vcmp.eq.s32.totalorder %v275_v17, %v292_v19  ;;  %v1246_v22 = vsel %vm279_vm2, 1.0, %v1578_v2  ;;  %v1285_v19 = vld [vmem:[%s1967_s3 + $0x70] sm:$0xff] }
  0x96   : > { %v1248_v25 = vsel %vm293_vm3, 1.0, %v1578_v2 }
  0x98   : > { %v285_v20 = vpop.permute.xlu0 %284 }
  0x99   : > { %v299_v21 = vpop.permute.xlu1 %298  ;;  %vm286_vm4 = vcmp.eq.s32.totalorder %v275_v17, %v285_v20  ;;  %v1282_v20 = vld [vmem:[%s1966_s2 + $0x78] sm:$0xff] }
  0x9a   : > { %vm300_vm5 = vcmp.eq.s32.totalorder %v275_v17, %v299_v21  ;;  %v1247_v23 = vsel %vm286_vm4, 1.0, %v1578_v2  ;;  %v1284_v21 = vld [vmem:[%s1967_s3 + $0x68] sm:$0xff] }
  0x9b   : > { %v289_v24 = vadd.f32 %v1247_v23, %v1246_v22  ;;  %v1249_v26 = vsel %vm300_vm5, 1.0, %v1578_v2  ;;  %v1281_v22 = vld [vmem:[%s1966_s2 + $0x70] sm:$0xff]  ;;  %v1283_v23 = vld [vmem:[%s1967_s3 + $0x60] sm:$0xff] }
  0x9d   : > { %v296_v27 = vadd.f32 %v1248_v25, %v289_v24  ;;  %v1280_v24 = vld [vmem:[%s1966_s2 + $0x68] sm:$0xff]  ;;  %v1279_v25 = vld [vmem:[%s1966_s2 + $0x60] sm:$0xff] }
  0x9f   : > { %v303_v28 = vadd.f32 %v1249_v26, %v296_v27  ;;  %v1276_v26 = vld [vmem:[%s1968_s4 + $0x2] ss:$0 sm:$0xff] }
  0xa1   : > { %1363 = vmatmul.mubr.msk.f32.vlgmr.msra.gmra.mxu0 %vm311_vm6, %v303_v28 }
  0xa2   : > { %1395 = vmatprep.mubr.msk.f32.mxu0 %vm1581_vm1, %v1578_v2  ;;  %1388 = vmatpush3.msra.mxu0 %v1262_v42 }
  0xa3   : > { %1389 = vmatprep.subr.mxu0 %v1578_v2 }
  0xa4   : > { %1390 = vmatpush3.msra.mxu0 %v1261_v43 }
  0xa5   : > { %1391 = vmatprep.subr.mxu0 %v1578_v2 }
  0xa6   : > { %1392 = vmatpush3.msra.mxu0 %v1260_v45 }
  0xa7   : > { %1393 = vmatprep.subr.mxu0 %v1578_v2 }
  0xa8   : > { %1394 = vmatpush3.msra.mxu0 %v1259_v47 }
  0xa9   : > { %1409 = vmatprep.subr.mxu0 %v1578_v2 }
 0x161   : > { %v385_v31 = vpop.f32.mrf.mxu0 }
 0x162   : > { %v1734_v32 = vmul.f32 0.25, %v385_v31 }
 0x163   : > { %v1364_v34 = vpop.f32.mrf.mxu0 }
 0x164   : > { %1374 = vmatmul.mubr.msk.f32.vlgmr.msra.gmra.mxu1 %vm419_vm7, %v1734_v32  ;;  %v493_v38 = vrot.slane %v1734_v32, 7 }
 0x165   : > { %1377 = vmatpush3.msra.mxu1 %v407_v33  ;;  %1384 = vmatprep.mubr.msk.f32.mxu1 %vm1581_vm1, %v1578_v2 }
 0x166   : > { %1378 = vmatprep.subr.mxu1 %v1578_v2  ;;  %v497_v41 = vsel %vm1758_vm8, 0.0, %v493_v38  ;;  %v1094_v38 = vld [vmem:[%s1969_s5 + $0x8] sm:$0xff] }
 0x167   : > { %1379 = vmatpush3.msra.mxu1 %v406_v35 }
 0x168   : > { %1380 = vmatprep.subr.mxu1 %v1578_v2 }
 0x169   : > { %1381 = vmatpush3.msra.mxu1 %v405_v37  ;;  %v1095_v37 = vld [vmem:[%s1969_s5 + $0x10] sm:$0xff] }
 0x16a   : > { %1382 = vmatprep.subr.mxu1 %v1578_v2 }
 0x16b   : > { %1383 = vmatpush3.msra.mxu1 %v404_v39  ;;  %v1093_v39 = vld [vmem:[%s1969_s5] sm:$0xff] }
 0x16c   : > { %1385 = vmatmul.mubr.msk.f32.vlgmr.msra.gmra.mxu1 %vm419_vm7, %v497_v41  ;;  %1398 = vmatprep.subr.mxu1 %v1578_v2 }
 0x16d   : > { %1406 = vmatprep.mubr.msk.f32.mxu1 %vm1581_vm1, %v1578_v2  ;;  %1399 = vmatpush3.msra.mxu1 %v1258_v44 }
 0x16e   : > { %1400 = vmatprep.subr.mxu1 %v1578_v2 }
 0x16f   : > { %1401 = vmatpush3.msra.mxu1 %v1257_v46 }
 0x170   : > { %1402 = vmatprep.subr.mxu1 %v1578_v2 }
 0x171   : > { %1403 = vmatpush3.msra.mxu1 %v1256_v48 }
 0x172   : > { %1404 = vmatprep.subr.mxu1 %v1578_v2 }
 0x173   : > { %1405 = vmatpush3.msra.mxu1 %v1255_v49 }
 0x174   : > { %1420 = vmatprep.subr.mxu1 %v1578_v2 }
 0x224   : > { %v489_v50 = vpop.f32.mrf.mxu1 }
 0x225   : > { %v490_v53 = vadd.f32 %v1252_v52, %v489_v50 }
 0x226   : > { %v1375_v51 = vpop.f32.mrf.mxu1 }
 0x22c   : > { %v567_v54 = vpop.f32.mrf.mxu1 }
 0x22d   : > { %v571_v55 = vadd.f32 %v567_v54, %v490_v53 }
 0x22e   : > { %v1386_v56 = vpop.f32.mrf.mxu1 }
 0x22f   : > { %v572_v57 = vmax.f32 %v571_v55, 0.0 }
 0x231   : > { %v664_v58 = vrot.slane %v572_v57, 7  ;;  %1396 = vmatmul.mubr.msk.f32.vlgmr.msra.gmra.mxu0 %vm419_vm7, %v572_v57  ;;  %v1097_v57 = vld [vmem:[%s1970_s6] sm:$0x1] }
 0x232   : > { %1417 = vmatprep.mubr.msk.f32.mxu0 %vm1581_vm1, %v1578_v2  ;;  %1410 = vmatpush3.msra.mxu0 %v1274_v60 }
 0x233   : > { %v665_v59 = vsel %vm1758_vm8, 0.0, %v664_v58  ;;  %1411 = vmatprep.subr.mxu0 %v1578_v2 }
 0x234   : > { %1407 = vmatmul.mubr.msk.f32.vlgmr.msra.gmra.mxu1 %vm419_vm7, %v665_v59  ;;  %1412 = vmatpush3.msra.mxu0 %v1273_v61 }
 0x235   : > { %1428 = vmatprep.mubr.msk.f32.mxu1 %vm1581_vm1, %v1578_v2  ;;  %1413 = vmatprep.subr.mxu0 %v1578_v2 }
 0x236   : > { %1421 = vmatpush3.msra.mxu1 %v1270_v62  ;;  %1414 = vmatpush3.msra.mxu0 %v1272_v63 }
 0x237   : > { %1422 = vmatprep.subr.mxu1 %v1578_v2  ;;  %1415 = vmatprep.subr.mxu0 %v1578_v2 }
 0x238   : > { %1423 = vmatpush3.msra.mxu1 %v1269_v0  ;;  %1416 = vmatpush3.msra.mxu0 %v1271_v1 }
 0x239   : > { %1424 = vmatprep.subr.mxu1 %v1578_v2  ;;  %1431 = vmatprep.subr.mxu0 %v1578_v2 }
 0x23a   : > { %1425 = vmatpush3.msra.mxu1 %v1268_v3 }
 0x23b   : > { %1426 = vmatprep.subr.mxu1 %v1578_v2 }
 0x23c   : > { %1427 = vmatpush3.msra.mxu1 %v1267_v4 }
 0x23d   : > { %1442 = vmatprep.subr.mxu1 %v1578_v2 }
 0x2f1   : > { %v660_v6 = vpop.f32.mrf.mxu0 }
 0x2f2   : > { %v661_v7 = vadd.f32 %v1264_v5, %v660_v6 }
 0x2f3   : > { %v1397_v8 = vpop.f32.mrf.mxu0 }
 0x2f4   : > { %v735_v9 = vpop.f32.mrf.mxu1 }
 0x2f5   : > { %v739_v10 = vadd.f32 %v735_v9, %v661_v7 }
 0x2f6   : > { %v1408_v11 = vpop.f32.mrf.mxu1 }
 0x2f7   : > { %v740_v12 = vmax.f32 %v739_v10, 0.0 }
 0x2f9   : > { %v741_v13 = vadd.f32 %v740_v12, %v1734_v32 }
 0x2fb   : > { %v1848_v14 = vmax.f32 %v741_v13, 0.0 }
 0x2fd   : > { %1418 = vmatmul.mubr.msk.f32.vlgmr.msra.gmra.mxu0 %vm419_vm7, %v1848_v14  ;;  %v834_v16 = vrot.slane %v1848_v14, 6 }
 0x2fe   : > { %1439 = vmatprep.mubr.msk.f32.mxu0 %vm1581_vm1, %v1578_v2  ;;  %1432 = vmatpush3.msra.mxu0 %v1286_v18 }
 0x2ff   : > { %v838_v17 = vsel %vm1852_vm9, 0.0, %v834_v16  ;;  %1433 = vmatprep.subr.mxu0 %v1578_v2 }
 0x300   : > { %1429 = vmatmul.mubr.msk.f32.vlgmr.msra.gmra.mxu1 %vm419_vm7, %v838_v17  ;;  %1434 = vmatpush3.msra.mxu0 %v1285_v19 }
 0x301   : > { %1450 = vmatprep.mubr.msk.f32.mxu1 %vm1581_vm1, %v1578_v2  ;;  %1435 = vmatprep.subr.mxu0 %v1578_v2 }
 0x302   : > { %1443 = vmatpush3.msra.mxu1 %v1282_v20  ;;  %1436 = vmatpush3.msra.mxu0 %v1284_v21 }
 0x303   : > { %1444 = vmatprep.subr.mxu1 %v1578_v2  ;;  %1437 = vmatprep.subr.mxu0 %v1578_v2 }
 0x304   : > { %1445 = vmatpush3.msra.mxu1 %v1281_v22  ;;  %1438 = vmatpush3.msra.mxu0 %v1283_v23 }
 0x305   : > { %1446 = vmatprep.subr.mxu1 %v1578_v2  ;;  %1453 = vmatprep.subr.mxu0 %v1578_v2 }
 0x306   : > { %1447 = vmatpush3.msra.mxu1 %v1280_v24 }
 0x307   : > { %1448 = vmatprep.subr.mxu1 %v1578_v2 }
 0x308   : > { %1449 = vmatpush3.msra.mxu1 %v1279_v25 }
 0x3bd   : > { %v830_v27 = vpop.f32.mrf.mxu0 }
 0x3be   : > { %v831_v28 = vadd.f32 %v1276_v26, %v830_v27 }
 0x3bf   : > { %v1419_v29 = vpop.f32.mrf.mxu0 }
 0x3c0   : > { %v908_v30 = vpop.f32.mrf.mxu1 }
 0x3c1   : > { %v912_v31 = vadd.f32 %v908_v30, %v831_v28 }
 0x3c2   : > { %v1430_v32 = vpop.f32.mrf.mxu1 }
 0x3c3   : > { %v913_v33 = vmax.f32 %v912_v31, 0.0 }
 0x3c5   : > { %v1005_v34 = vrot.slane %v913_v33, 6  ;;  %1440 = vmatmul.mubr.msk.f32.vlgmr.msra.gmra.mxu0 %vm419_vm7, %v913_v33 }
 0x3c6   : > { %1461 = vmatprep.mubr.msk.f32.mxu0 %vm1581_vm1, %v1578_v2  ;;  %1454 = vmatpush3.msra.mxu0 %v1096_v36 }
 0x3c7   : > { %v1006_v35 = vsel %vm1852_vm9, 0.0, %v1005_v34  ;;  %1455 = vmatprep.subr.mxu0 %v1578_v2 }
 0x3c8   : > { %1451 = vmatmul.mubr.msk.f32.vlgmr.msra.gmra.mxu1 %vm419_vm7, %v1006_v35  ;;  %1456 = vmatpush3.msra.mxu0 %v1095_v37 }
 0x3c9   : > { %1457 = vmatprep.subr.mxu0 %v1578_v2 }
 0x3ca   : > { %1458 = vmatpush3.msra.mxu0 %v1094_v38 }
 0x3cb   : > { %1459 = vmatprep.subr.mxu0 %v1578_v2 }
 0x3cc   : > { %1460 = vmatpush3.msra.mxu0 %v1093_v39 }
 0x485   : > { %v1001_v41 = vpop.f32.mrf.mxu0 }
 0x486   : > { %v1002_v42 = vadd.f32 %v1288_v40, %v1001_v41 }
 0x487   : > { %v1441_v43 = vpop.f32.mrf.mxu0 }
 0x488   : > { %v1076_v44 = vpop.f32.mrf.mxu1 }
 0x489   : > { %v1080_v45 = vadd.f32 %v1076_v44, %v1002_v42 }
 0x48a   : > { %v1452_v46 = vpop.f32.mrf.mxu1 }
 0x48b   : > { %v1081_v47 = vmax.f32 %v1080_v45, 0.0 }
 0x48d   : > { %v1082_v2 = vadd.f32 %v1081_v47, %v1848_v14 }
 0x48f   : > { %v1083_v48 = vmax.f32 %v1082_v2, 0.0 }
 0x491   : > { %v1084_v49 = vsel %vm419_vm7, %v1083_v48, 0.0 }
 0x492   : > { %v1085_v50 = vrot.slane %v1084_v49, 4 }
 0x494   : > { %v1086_v51 = vadd.f32 %v1085_v50, %v1084_v49 }
 0x496   : > { %v1087_v52 = vrot.slane %v1086_v51, 2 }
 0x498   : > { %v1088_v53 = vadd.f32 %v1087_v52, %v1086_v51 }
 0x49a   : > { %v1089_v54 = vrot.slane %v1088_v53, 1 }
 0x49c   : > { %v1090_v55 = vadd.f32 %v1089_v54, %v1088_v53 }
 0x49e   : > { %v1092_v56 = vmul.f32 0.125, %v1090_v55 }
 0x4a0   : > { %1462 = vmatmul.mubr.msk.f32.vlgmr.msra.gmra.mxu0 %vm419_vm7, %v1092_v56 }
 0x560   : > { %v1167_v58 = vpop.f32.mrf.mxu0 }
 0x561   : > { %v1168_v59 = vadd.f32 %v1167_v58, %v1097_v57 }
 0x562   : > { %v1463_v60 = vpop.f32.mrf.mxu0 }
 0x563   : > { %v1171_v61 = vmax.f32 %v1168_v59, 0.0 }
 0x565   : > { %1172 = vst [vmem:[%s268_s18] sm:$0x1] %v1171_v61 }
 0x566   : > { %1527 = shalt.err (!%p1524_p3)
}
 0x567   : > { %s1528_s13 = scalar_lea.hbm %s1184_s22, 16  ;;  %s1532_s16 = scalar_lea.hbm %s1971_s7, 32 }
 0x568   : > { %p1529_p4 = scmp.ne.s32.totalorder %s1184_s22, %s1528_s13  ;;  %p1533_p9 = scmp.lt.s32.totalorder %s1184_s22, %s1971_s7 }
 0x569   : > { %p1534_p10 = scmp.lt.s32.totalorder %s1532_s16, %s1528_s13 }
 0x56a   : > { %p1530_p7 = pnand %p1529_p4, %p1661_p5 }
 0x56b   : > { %p1535_p11 = por %p1534_p10, %p1533_p9 }
 0x56c   : > { %p1531_p8 = pneg %p1530_p7 }
 0x56e   : > { %p1536_p12 = pnand %p1535_p11, %p1531_p8 }
 0x570   : > { %1539 = shalt.err (!%p1536_p12)
}
 0x571   : > { %1464 = dma.vmem_to_hbm [thread:$0]  (%p1661_p5), %s1187_s19, 16, %s1184_s22, %s1174_s23  }
 0x572 PF: > { %p1470_p13 = scmp.ge.s32.totalorder %s1574_s27, 2  ;;  %s1198_s20 = sand.u32 1, %s1562_s24  }
 0x573   : > { %s1199_s21 = scalar_lea.sflag [#allocation3], %s1198_s20 }
 0x574   : > { %p1467_p0 = pnand %p1470_p13, %p1665_p6 }
 0x576   : > { %p1468_p1 = pneg %p1467_p0 }
 0x578   : > { %1557 = dma.done.wait (%p1468_p1), %s1199_s21, 16  }
 0x579   : > { %1559 = vsyncadd (%p1468_p1), %s1199_s21, 4294967280  ;;  %p17_p2 = scmp.ge.s32.totalorder %s1648_s30, 4   ;;  %s1978_s24 = smov %s1566_s25 }
 0x57a   : > { %s1979_s25 = smov %s1570_s26  ;;  %s1980_s26 = smov %s1659_s10 }
 0x57b   : > { %s1981_s27 = smov %s1648_s30  ;;  %19 = sbr.rel (!%p17_p2) target bundleno = 3 (0x3), region = 92 }
 0x580   :  { %1203 = vsyncpa [#allocation3], 1 }
 0x581   :  { %1205 = vsyncpa [#allocation3 + $0x1], 1 }

</bundles_post_ra>
